<compile_context>
chip_gen: v5e
topology: v5e:2x2
jax: 0.10.0
libtpu: 0.0.40
codegen_flags: <defaults>
</compile_context>

<pallas_src>
import functools
import math

import jax
import jax.numpy as jnp
from jax.experimental import pallas as pl
from jax.experimental.pallas import tpu as pltpu

NEG_INF = -1e9


def _round_up(x, m):
    return ((x + m - 1) // m) * m


# --------------------------------------------------------------------------
# Pallas kernels
# --------------------------------------------------------------------------
def _linear_kernel(x_ref, w_ref, b_ref, o_ref, *, activation):
    x = x_ref[...].astype(jnp.bfloat16)                     # bf16 MXU operands
    y = jnp.dot(x, w_ref[...], preferred_element_type=jnp.float32) + b_ref[...]
    if activation == "relu":
        y = jnp.maximum(y, 0.0)
    o_ref[...] = y.astype(o_ref.dtype)


def linear(x, w, b, activation=None, block_m=256):
    """x: (M, K) f32, w: (K, N) bf16, b: (N,) f32 -> (M, N) f32. Bias(+ReLU) fused."""
    M, K = x.shape
    N = w.shape[1]
    tm = min(block_m, _round_up(M, 8))
    Mp = _round_up(M, tm)
    xp = jnp.pad(x, ((0, Mp - M), (0, 0))) if Mp != M else x
    # TODO(synk): for large K/N (big d_ffn / n_vocab) tile N and add a k grid
    #             axis with a VMEM accumulator so the resident weight fits
    #             v7x's 64 MiB VMEM; not needed at these shapes.
    out = pl.pallas_call(
        functools.partial(_linear_kernel, activation=activation),
        out_shape=jax.ShapeDtypeStruct((Mp, N), jnp.float32),
        grid=(Mp // tm,),
        in_specs=[
            pl.BlockSpec((tm, K), lambda i: (i, 0)),
            pl.BlockSpec((K, N), lambda i: (0, 0)),
            pl.BlockSpec((1, N), lambda i: (0, 0)),
        ],
        out_specs=pl.BlockSpec((tm, N), lambda i: (i, 0)),
        compiler_params=pltpu.CompilerParams(dimension_semantics=("parallel",)),
    )(xp, w, b.reshape(1, N))
    return out if Mp == M else out[:M]


def _ffn_kernel(x_ref, w1_ref, b1_ref, w2_ref, b2_ref, o_ref):
    x = x_ref[...].astype(jnp.bfloat16)
    h = jnp.dot(x, w1_ref[...], preferred_element_type=jnp.float32) + b1_ref[...]
    h = jnp.maximum(h, 0.0)
    y = jnp.dot(h.astype(jnp.bfloat16), w2_ref[...],
                preferred_element_type=jnp.float32) + b2_ref[...]
    o_ref[...] = y.astype(o_ref.dtype)


def ffn_fused(x, w1, b1, w2, b2, block_m=256):
    """Fused matmul->ReLU->matmul; hidden activation never touches HBM."""
    M, D = x.shape
    F = w1.shape[1]
    tm = min(block_m, _round_up(M, 8))
    Mp = _round_up(M, tm)
    xp = jnp.pad(x, ((0, Mp - M), (0, 0))) if Mp != M else x
    out = pl.pallas_call(
        _ffn_kernel,
        out_shape=jax.ShapeDtypeStruct((Mp, D), jnp.float32),
        grid=(Mp // tm,),
        in_specs=[
            pl.BlockSpec((tm, D), lambda i: (i, 0)),
            pl.BlockSpec((D, F), lambda i: (0, 0)),
            pl.BlockSpec((1, F), lambda i: (0, 0)),
            pl.BlockSpec((F, D), lambda i: (0, 0)),
            pl.BlockSpec((1, D), lambda i: (0, 0)),
        ],
        out_specs=pl.BlockSpec((tm, D), lambda i: (i, 0)),
        compiler_params=pltpu.CompilerParams(dimension_semantics=("parallel",)),
    )(xp, w1, b1.reshape(1, F), w2, b2.reshape(1, D))
    return out if Mp == M else out[:M]


def _add_ln_kernel(x_ref, y_ref, g_ref, b_ref, o_ref, *, eps):
    x = x_ref[...].astype(jnp.float32) + y_ref[...].astype(jnp.float32)
    mu = jnp.mean(x, axis=-1, keepdims=True)
    var = jnp.mean(jnp.square(x - mu), axis=-1, keepdims=True)
    y = (x - mu) * jax.lax.rsqrt(var + eps)
    o_ref[...] = (y * g_ref[...] + b_ref[...]).astype(o_ref.dtype)


def add_layer_norm(x, y, gamma, beta, eps=1e-6, block_m=256):
    """LayerNorm(x + y) over last dim, residual add fused in-kernel."""
    M, D = x.shape
    tm = min(block_m, _round_up(M, 8))
    Mp = _round_up(M, tm)
    if Mp != M:
        x = jnp.pad(x, ((0, Mp - M), (0, 0)))
        y = jnp.pad(y, ((0, Mp - M), (0, 0)))
    out = pl.pallas_call(
        functools.partial(_add_ln_kernel, eps=eps),
        out_shape=jax.ShapeDtypeStruct((Mp, D), jnp.float32),
        grid=(Mp // tm,),
        in_specs=[
            pl.BlockSpec((tm, D), lambda i: (i, 0)),
            pl.BlockSpec((tm, D), lambda i: (i, 0)),
            pl.BlockSpec((1, D), lambda i: (0, 0)),
            pl.BlockSpec((1, D), lambda i: (0, 0)),
        ],
        out_specs=pl.BlockSpec((tm, D), lambda i: (i, 0)),
        compiler_params=pltpu.CompilerParams(dimension_semantics=("parallel",)),
    )(x, y, gamma.reshape(1, D), beta.reshape(1, D))
    return out if Mp == M else out[:M]


def _attention_kernel(q_ref, k_ref, v_ref, kvalid_ref, o_ref, *,
                      scale, causal, n_head, d_k):
    # q_ref/k_ref/v_ref: (H, S, d_k); kvalid_ref: (1, Sk); o_ref: (Sq, H*d_k)
    sq = q_ref.shape[1]
    sk = k_ref.shape[1]
    # Key-padding (+ causal) additive mask built in-kernel (f32, no HBM array).
    # NOTE: matches the reference module — a fully-masked row yields a uniform
    # softmax over (padded) keys; those rows are masked out in the loss.
    bias = jnp.where(kvalid_ref[...] > 0.5, 0.0, NEG_INF)            # (1, Sk)
    if causal:
        row = jax.lax.broadcasted_iota(jnp.int32, (sq, sk), 0)
        col = jax.lax.broadcasted_iota(jnp.int32, (sq, sk), 1)
        bias = bias + jnp.where(col <= row, 0.0, NEG_INF)            # (Sq, Sk)
    for h in range(n_head):                                          # static loop
        q = q_ref[h].astype(jnp.bfloat16)                            # (Sq, dk)
        k = k_ref[h].astype(jnp.bfloat16)                            # (Sk, dk)
        v = v_ref[h].astype(jnp.bfloat16)                            # (Sk, dk)
        s = jnp.dot(q, k.T, preferred_element_type=jnp.float32) * scale + bias
        s = s - jnp.max(s, axis=-1, keepdims=True)
        p = jnp.exp(s)                                               # f32 softmax
        p = p * pl.reciprocal(jnp.sum(p, axis=-1, keepdims=True), approx=True)
        o = jnp.dot(p.astype(jnp.bfloat16), v, preferred_element_type=jnp.float32)
        o_ref[:, h * d_k:(h + 1) * d_k] = o.astype(o_ref.dtype)


def scaled_dot_attention(q, k, v, kvalid, d_k, causal=False):
    """q,k,v: (B, H, S, d_k) f32; kvalid: (B, 1, Sk) f32 -> (B, Sq, H*d_k) f32."""
    B, H, Sq, dk = q.shape
    Sk = k.shape[2]
    return pl.pallas_call(
        functools.partial(_attention_kernel, scale=1.0 / math.sqrt(d_k),
                          causal=causal, n_head=H, d_k=dk),
        out_shape=jax.ShapeDtypeStruct((B, Sq, H * dk), jnp.float32),
        grid=(B,),
        in_specs=[
            pl.BlockSpec((pl.Squeezed(), H, Sq, dk), lambda b: (b, 0, 0, 0)),
            pl.BlockSpec((pl.Squeezed(), H, Sk, dk), lambda b: (b, 0, 0, 0)),
            pl.BlockSpec((pl.Squeezed(), H, Sk, dk), lambda b: (b, 0, 0, 0)),
            pl.BlockSpec((pl.Squeezed(), 1, Sk), lambda b: (b, 0, 0)),
        ],
        out_specs=pl.BlockSpec((pl.Squeezed(), Sq, H * dk), lambda b: (b, 0, 0)),
        compiler_params=pltpu.CompilerParams(dimension_semantics=("parallel",)),
    )(q, k, v, kvalid)


# --------------------------------------------------------------------------
# Transformer building blocks (glue around the Pallas kernels)
# --------------------------------------------------------------------------
def multi_head_self_attention(p, x, kvalid, n_head, d_k, causal):
    B, S, D = x.shape
    dh = n_head * d_k
    qkv = linear(x.reshape(B * S, D), p["wqkv"], p["bqkv"])           # fused Q|K|V
    qkv = qkv.reshape(B, S, 3, n_head, d_k).transpose(2, 0, 3, 1, 4)  # (3,B,H,S,dk)
    o = scaled_dot_attention(qkv[0], qkv[1], qkv[2], kvalid, d_k, causal)
    return linear(o.reshape(B * S, dh), p["wo"], p["bo"]).reshape(B, S, D)


def multi_head_cross_attention(p, x_q, x_kv, kvalid, n_head, d_k):
    B, Sq, D = x_q.shape
    Sk = x_kv.shape[1]
    dh = n_head * d_k
    q = linear(x_q.reshape(B * Sq, D), p["wq"], p["bq"])
    q = q.reshape(B, Sq, n_head, d_k).transpose(0, 2, 1, 3)
    kv = linear(x_kv.reshape(B * Sk, D), p["wkv"], p["bkv"])          # fused K|V
    kv = kv.reshape(B, Sk, 2, n_head, d_k).transpose(2, 0, 3, 1, 4)
    o = scaled_dot_attention(q, kv[0], kv[1], kvalid, d_k, causal=False)
    return linear(o.reshape(B * Sq, dh), p["wo"], p["bo"]).reshape(B, Sq, D)


def add_norm(p, x, y):
    B, S, D = x.shape
    return add_layer_norm(x.reshape(B * S, D), y.reshape(B * S, D),
                          p["g"], p["b"]).reshape(B, S, D)


def ffn(p, x):
    B, S, D = x.shape
    return ffn_fused(x.reshape(B * S, D), p["w1"], p["b1"],
                     p["w2"], p["b2"]).reshape(B, S, D)


def encoder_layer(p, x, kvalid, n_head, d_k):
    x = add_norm(p["ln1"], x,
                 multi_head_self_attention(p["attn"], x, kvalid, n_head, d_k,
                                           causal=False))
    x = add_norm(p["ln2"], x, ffn(p["ffn"], x))
    return x


def decoder_layer(p, x, enc_value, self_kvalid, cross_kvalid, n_head, d_k):
    x = add_norm(p["ln1"], x,
                 multi_head_self_attention(p["self_attn"], x, self_kvalid,
                                           n_head, d_k, causal=True))
    x = add_norm(p["ln2"], x,
                 multi_head_cross_attention(p["cross_attn"], x, enc_value,
                                            cross_kvalid, n_head, d_k))
    x = add_norm(p["ln3"], x, ffn(p["ffn"], x))
    return x


def pos_encoder(params, enc_input, cfg):
    """enc_input: (B, S_enc, d_input) box positions -> (enc_value, enc_mask)."""
    B, S, _ = enc_input.shape
    enc_mask = jnp.sum(jnp.abs(enc_input), axis=-1) > 0               # True = real box
    kvalid = enc_mask.astype(jnp.float32).reshape(B, 1, S)
    x = linear(enc_input.reshape(B * S, cfg["d_input"]),
               params["in_w"], params["in_b"]).reshape(B, S, cfg["d_model"])
    for lp in params["layers"]:
        x = encoder_layer(lp, x, kvalid, cfg["n_head"], cfg["d_k"])
    return x, enc_mask


def decoder(params, dec_input, enc_value, enc_mask, cfg, is_greedy=False):
    # TODO(synk): is_greedy=True autoregressive greedy decode loop not implemented;
    #             this is the teacher-forcing (is_greedy=False) path.
    B, T = dec_input.shape
    S = enc_value.shape[1]
    x = params["emb"][dec_input] + params["pos_table"][:T][None, :, :]
    self_kvalid = (dec_input != cfg["pad_idx"]).astype(jnp.float32).reshape(B, 1, T)
    cross_kvalid = enc_mask.astype(jnp.float32).reshape(B, 1, S)
    for lp in params["layers"]:
        x = decoder_layer(lp, x, enc_value, self_kvalid, cross_kvalid,
                          cfg["n_head"], cfg["d_k"])
    flat = x.reshape(B * T, cfg["d_model"])
    head = linear(flat, params["head_w"], params["head_b"])           # fused cls|box
    nv = cfg["n_vocab"]
    cls_logits = head[:, :nv].reshape(B, T, nv)
    boxes = jax.nn.sigmoid(head[:, nv:nv + 4]).reshape(B, T, 4)
    return cls_logits, boxes


def pos_structure_forward(params, enc_input, dec_input, cfg, is_greedy=False):
    enc_value, enc_mask = pos_encoder(params["enc"], enc_input, cfg)
    return decoder(params["dec"], dec_input, enc_value, enc_mask, cfg, is_greedy)


# --------------------------------------------------------------------------
# Deterministic parameter initialization (synthetic weights, not a checkpoint)
# --------------------------------------------------------------------------
def sinusoid_table(n_pos, d_model):
    pos = jnp.arange(n_pos, dtype=jnp.float32)[:, None]
    i = jnp.arange(d_model, dtype=jnp.float32)[None, :]
    angle = pos / jnp.power(10000.0, (2.0 * jnp.floor(i / 2.0)) / d_model)
    return jnp.where(jnp.arange(d_model)[None, :] % 2 == 0,
                     jnp.sin(angle), jnp.cos(angle)).astype(jnp.float32)


def _dense(key, fan_in, fan_out):
    w = 0.02 * jax.random.normal(key, (fan_in, fan_out), jnp.float32)
    return w.astype(jnp.bfloat16), jnp.zeros((fan_out,), jnp.float32)


def init_params(key, cfg):
    keys = iter(jax.random.split(key, 256))
    d_model = cfg["d_model"]
    dh = cfg["n_head"] * cfg["d_k"]

    def self_attn_p():
        wqkv, bqkv = _dense(next(keys), d_model, 3 * dh)
        wo, bo = _dense(next(keys), dh, d_model)
        return dict(wqkv=wqkv, bqkv=bqkv, wo=wo, bo=bo)

    def cross_attn_p():
        wq, bq = _dense(next(keys), d_model, dh)
        wkv, bkv = _dense(next(keys), d_model, 2 * dh)
        wo, bo = _dense(next(keys), dh, d_model)
        return dict(wq=wq, bq=bq, wkv=wkv, bkv=bkv, wo=wo, bo=bo)

    def ffn_p():
        w1, b1 = _dense(next(keys), d_model, cfg["d_ffn"])
        w2, b2 = _dense(next(keys), cfg["d_ffn"], d_model)
        return dict(w1=w1, b1=b1, w2=w2, b2=b2)

    def ln_p():
        return dict(g=jnp.ones((d_model,), jnp.float32),
                    b=jnp.zeros((d_model,), jnp.float32))

    in_w, in_b = _dense(next(keys), cfg["d_input"], d_model)
    enc = dict(in_w=in_w, in_b=in_b,
               layers=[dict(attn=self_attn_p(), ffn=ffn_p(), ln1=ln_p(), ln2=ln_p())
                       for _ in range(cfg["enc_layers"])])

    emb = 0.02 * jax.random.normal(next(keys), (cfg["n_vocab"], d_model), jnp.float32)
    emb = emb.at[cfg["pad_idx"]].set(0.0)      # padding_idx row = 0, like nn.Embedding
    head_w, head_b = _dense(next(keys), d_model, cfg["n_vocab"] + 4)   # cls|box fused
    dec = dict(emb=emb,
               pos_table=sinusoid_table(cfg["dec_n_pos"], d_model),
               layers=[dict(self_attn=self_attn_p(), cross_attn=cross_attn_p(),
                            ffn=ffn_p(), ln1=ln_p(), ln2=ln_p(), ln3=ln_p())
                       for _ in range(cfg["dec_layers"])],
               head_w=head_w, head_b=head_b)
    return dict(enc=enc, dec=dec)


# --------------------------------------------------------------------------
if __name__ == "__main__":
    cfg = dict(d_input=4, d_model=32, enc_layers=2, n_vocab=10, dec_len=8,
               n_head=4, d_k=8, d_ffn=64, dec_n_pos=16, dec_layers=2, pad_idx=0)

    key = jax.random.PRNGKey(0)
    pkey, ekey, dkey = jax.random.split(key, 3)
    params = init_params(pkey, cfg)

    B, S_enc = 2, 16
    enc_input = jax.random.normal(ekey, (B, S_enc, cfg["d_input"]), jnp.float32)
    enc_input = enc_input.at[1, -4:, :].set(0.0)          # padded boxes in sample 1
    dec_input = jax.random.randint(dkey, (B, cfg["dec_len"]), 1, cfg["n_vocab"])
    dec_input = dec_input.at[1, -2:].set(cfg["pad_idx"]).astype(jnp.int32)

    cls_logits, boxes = pos_structure_forward(params, enc_input, dec_input, cfg,
                                              is_greedy=False)
    jax.block_until_ready((cls_logits, boxes))

    assert cls_logits.shape == (B, cfg["dec_len"], cfg["n_vocab"])
    assert boxes.shape == (B, cfg["dec_len"], 4)
    assert bool(jnp.all(jnp.isfinite(cls_logits))) and bool(jnp.all(jnp.isfinite(boxes)))
    print("KERNEL_OK")
</pallas_src>

<mosaic_0001>
module attributes {stable_mosaic.version = 11 : i64} {
  func.func @_linear_kernel(%arg0: i32, %arg1: memref<32x4xf32, #tpu.memory_space<vmem>>, %arg2: memref<4x32xbf16, #tpu.memory_space<vmem>>, %arg3: memref<1x32xf32, #tpu.memory_space<vmem>>, %arg4: memref<32x32xf32, #tpu.memory_space<vmem>>) attributes {dimension_semantics = [#tpu.dimension_semantics<parallel>], iteration_bounds = array<i64: 1>, scalar_prefetch = 0 : i64, scratch_operands = 0 : i64, tpu.core_type = #tpu.core_type<tc>, window_params = [{transform_indices = @transform_0, window_bounds = array<i64: 32, 4>}, {pipeline_mode = #tpu.pipeline_mode<synchronous>, transform_indices = @transform_1, window_bounds = array<i64: 4, 32>}, {pipeline_mode = #tpu.pipeline_mode<synchronous>, transform_indices = @transform_2, window_bounds = array<i64: 1, 32>}, {transform_indices = @transform_3, window_bounds = array<i64: 32, 32>}]} {
    %c0 = arith.constant 0 : index
    %c0_0 = arith.constant 0 : index
    %0 = vector.load %arg1[%c0, %c0_0] : memref<32x4xf32, #tpu.memory_space<vmem>>, vector<32x4xf32>
    %1 = arith.truncf %0 : vector<32x4xf32> to vector<32x4xbf16>
    %c0_1 = arith.constant 0 : index
    %c0_2 = arith.constant 0 : index
    %2 = vector.load %arg2[%c0_1, %c0_2] : memref<4x32xbf16, #tpu.memory_space<vmem>>, vector<4x32xbf16>
    %cst = arith.constant dense<0.000000e+00> : vector<32x32xf32>
    %3 = tpu.matmul %1, %2, %cst {dimension_numbers = #tpu.dot_dimension_numbers<[1], [0], [0], [1], [0, 0, 1, 1], [], []>} : vector<32x4xbf16>, vector<4x32xbf16>, vector<32x32xf32> -> vector<32x32xf32>
    %c0_3 = arith.constant 0 : index
    %c0_4 = arith.constant 0 : index
    %4 = vector.load %arg3[%c0_3, %c0_4] : memref<1x32xf32, #tpu.memory_space<vmem>>, vector<1x32xf32>
    %5 = vector.broadcast %4 : vector<1x32xf32> to vector<32x32xf32>
    %6 = arith.addf %3, %5 : vector<32x32xf32>
    %c0_5 = arith.constant 0 : index
    %c0_6 = arith.constant 0 : index
    %7 = vector.load %arg4[%c0_5, %c0_6] : memref<32x32xf32, #tpu.memory_space<vmem>>, vector<32x32xf32>
    tpu.vector_store %arg4[%c0_5, %c0_6], %6 {strides = array<i32>} : memref<32x32xf32, #tpu.memory_space<vmem>>, vector<32x32xf32>,
    return
  }
  func.func @transform_0(%arg0: i32) -> (i32, i32) {
    %c0_i32 = arith.constant 0 : i32
    %c0_i32_0 = arith.constant 0 : i32
    return %arg0, %c0_i32 : i32, i32
  }
  func.func @transform_1(%arg0: i32) -> (i32, i32) {
    %c0_i32 = arith.constant 0 : i32
    %c0_i32_0 = arith.constant 0 : i32
    %c0_i32_1 = arith.constant 0 : i32
    return %c0_i32, %c0_i32_0 : i32, i32
  }
  func.func @transform_2(%arg0: i32) -> (i32, i32) {
    %c0_i32 = arith.constant 0 : i32
    %c0_i32_0 = arith.constant 0 : i32
    %c0_i32_1 = arith.constant 0 : i32
    return %c0_i32, %c0_i32_0 : i32, i32
  }
  func.func @transform_3(%arg0: i32) -> (i32, i32) {
    %c0_i32 = arith.constant 0 : i32
    %c0_i32_0 = arith.constant 0 : i32
    return %arg0, %c0_i32 : i32, i32
  }
}

</mosaic_0001>

<bundles_post_ra>
// kernel: tpu_custom_call.1
= control target key start
LH: loop header
LB: loop body
LE: loop exit
PB: predicated region body
PF: predicated region fallthrough
CT: control target
= control target key end

     0   :  { %vm34_vm0 = vcmask 1041408   ;;  %vm27_vm1 = vcmask 31744   ;;  %s161_s0 = inlined_call_operand.vmem [shape: f32[32,4], index: 0, kind: input, shape index: {}]   ;;  %s162_s1 = inlined_call_operand.vmem [shape: bf16[4,32], index: 1, kind: input, shape index: {}]   ;;  %s163_s2 = inlined_call_operand.vmem [shape: f32[1,32], index: 2, kind: input, shape index: {}]   ;;  %s164_s3 = inlined_call_operand.hbm [shape: f32[32,32], index: 3, kind: output, shape index: {}]  }
   0x1   :  { %v22_v0 = vld [vmem:[%s162_s1] sm:$0x3]  ;;  %v17_v2 = vld [vmem:[%s161_s0 + $0x8] sm:$0xff]  ;;  %v18_v5 = vld [vmem:[%s161_s0 + $0x10] sm:$0xff] }
   0x2   :  { %v16_v1 = vld [vmem:[%s161_s0] sm:$0xff]  ;;  %v36_v3 = vsel %vm34_vm0, %v22_v0, 0  ;;  %v19_v6 = vld [vmem:[%s161_s0 + $0x18] sm:$0xff] }
   0x3   :  { %v20_v4 = vpack.c.bf16 %v17_v2, %v16_v1  ;;  %45 = vmatpush.bf16.msra.mxu0 %v36_v3  ;;  %82 = vmatpush.bf16.msra.mxu1 %v36_v3  ;;  %v21_v7 = vpack.c.bf16 %v19_v6, %v18_v5 }
   0x4   :  { %8 = vsyncpa [#allocation3], 0  ;;  %v86_v8 = vld [vmem:[%s163_s2] ss:$0 sm:$0xff]  ;;  %vm57_vm2 = vcmask 261120   ;;  %s113_s0 = smov [#allocation2]  }
   0x5   :  { %s66_s23 = sshll.u32 %s113_s0, 4  ;;  %s68_s26 = sshll.u32 %s164_s3, 4  ;;  %s67_s23 = int_to_ptr.vmem [resolvable:$true] %s66_s23  ;;  %s69_s26 = int_to_ptr.hbm [resolvable:$true] %s68_s26 }
   0x6   :  { %80 = vmatmul.msk.bf16.vlgmr.msra.gmra.mxu0 %vm27_vm1, %v20_v4  ;;  %81 = vmatmul.msk.bf16.vlgmr.msra.gmra.mxu1 %vm27_vm1, %v21_v7  ;;  %s114_s2 = smov 128   ;;  %s115_s27 = smov 8  }
  0x83   :  { %v47_v9 = vpop.f32.mrf.mxu0  ;;  %v52_v10 = vpop.f32.mrf.mxu1 }
  0x84   :  { %v48_v11 = vadd.f32 %v86_v8, %v47_v9  ;;  %v53_v12 = vadd.f32 %v86_v8, %v52_v10 }
  0x86   :  { %58 = vst.msk [vmem:[#allocation2] sm:$0xff] %vm57_vm2, %v48_v11 }
  0x87   :  { %60 = vst.msk [vmem:[#allocation2 + $0x10] sm:$0xff] %vm57_vm2, %v53_v12 }
  0x8b   :  { %v49_v13 = vpop.f32.mrf.mxu0  ;;  %v54_v14 = vpop.f32.mrf.mxu1 }
  0x8c   :  { %v50_v15 = vadd.f32 %v86_v8, %v49_v13  ;;  %v55_v16 = vadd.f32 %v86_v8, %v54_v14 }
  0x8e   :  { %59 = vst.msk [vmem:[#allocation2 + $0x8] sm:$0xff] %vm57_vm2, %v50_v15 }
  0x8f   :  { %61 = vst.msk [vmem:[#allocation2 + $0x18] sm:$0xff] %vm57_vm2, %v55_v16 }
  0x90   :  { %74 = dma.vmem_to_hbm [thread:$0]  %s67_s23, 512, %s69_s26, [#allocation3], %s114_s2, %s114_s2, %s115_s27  }
  0x91   :  { %111 = dma.done.wait [#allocation3], 512  }
  0x92   :  { %112 = vsyncadd [#allocation3], 4294966784 }
  0x93   :  { %79 = vsyncpa [#allocation3], 1 }

</bundles_post_ra>
